<compile_context>
chip_gen: v5e
topology: v5e:2x2
jax: 0.10.0
libtpu: 0.0.40
codegen_flags: <defaults>
</compile_context>

<pallas_src>
import jax
import jax.numpy as jnp
from jax.experimental import pallas as pl
from jax.experimental.pallas import tpu as pltpu

# Small, module-consistent sizes.
BATCH = 2
SEQ = 8
EMBED = 32    # embed_size
HIDDEN = 64   # hidden_size
HPAD = 128    # hidden dim zero-padded to one full 128-lane tile (host, once)


def ffn_kernel(x_ref, w1t_ref, b1_ref, w2t_ref, b2_ref, o_ref):
    """out = fc2(relu(fc1(x))), single invocation over the whole problem.

    x_ref   : (R, E)     f32 activations, R = N*S
    w1t_ref : (E, HPAD)  bf16 fc1 weight, pre-transposed + zero-padded at init
    b1_ref  : (1, HPAD)  f32 fc1 bias, zero-padded
    w2t_ref : (HPAD, E)  bf16 fc2 weight, pre-transposed + zero-padded
    b2_ref  : (1, E)     f32 fc2 bias
    o_ref   : (R, E)     f32 output
    """
    # bf16 MXU operands, f32 accumulation, f32 (VPU) bias+ReLU epilogue.
    x = x_ref[...].astype(jnp.bfloat16)
    h = jnp.dot(x, w1t_ref[...], preferred_element_type=jnp.float32)   # (R, HPAD)
    h = jnp.maximum(h + b1_ref[...], 0.0)                              # ReLU, f32
    out = jnp.dot(h.astype(jnp.bfloat16), w2t_ref[...],
                  preferred_element_type=jnp.float32)                  # (R, E)
    o_ref[...] = out + b2_ref[...]                                     # single full store


def prepare_params(w1, b1, w2, b2, hpad=HPAD):
    """One-time, host-side layout prep (NOT in the per-call hot path).

    Takes torch nn.Linear layout (weight (out, in), bias (out,)) and returns
    pre-transposed, hidden-dim zero-padded bf16 weights plus f32 bias rows so
    the per-call path contains no transposes / reshapes / casts.
    Zero padding is exact: padded hidden units see relu(0 + 0) = 0 and the
    corresponding fc2 rows are zero, contributing nothing to the output.
    """
    H, E = w1.shape
    w1t = jnp.zeros((E, hpad), jnp.bfloat16).at[:, :H].set(w1.T.astype(jnp.bfloat16))
    b1r = jnp.zeros((1, hpad), jnp.float32).at[:, :H].set(b1.astype(jnp.float32))
    w2t = jnp.zeros((hpad, E), jnp.bfloat16).at[:H, :].set(w2.T.astype(jnp.bfloat16))
    b2r = b2.astype(jnp.float32).reshape(1, E)
    return w1t, b1r, w2t, b2r


@jax.jit
def feed_forward(x, w1t, b1r, w2t, b2r):
    """x: (N, S, E) f32.  Params as produced by `prepare_params`."""
    N, S, E = x.shape
    R = N * S
    hpad = w1t.shape[1]

    flops = 2 * R * E * hpad + 2 * R * hpad * E
    bytes_accessed = (R * E * 4            # x in
                      + w1t.size * 2 + b1r.size * 4
                      + w2t.size * 2 + b2r.size * 4
                      + R * E * 4)         # out
    vmem_spec = pl.BlockSpec(memory_space=pltpu.MemorySpace.VMEM)

    out2d = pl.pallas_call(
        ffn_kernel,
        out_shape=jax.ShapeDtypeStruct((R, E), jnp.float32),
        in_specs=[vmem_spec] * 5,
        out_specs=vmem_spec,
        cost_estimate=pl.CostEstimate(flops=flops,
                                      transcendentals=0,
                                      bytes_accessed=bytes_accessed),
    )(x.reshape(R, E), w1t, b1r, w2t, b2r)   # reshape = contiguous bitcast under jit

    return out2d.reshape(N, S, E)


def reference_ffn(x, w1, b1, w2, b2):
    """Pure-JAX (f32) transcription of the PyTorch forward, for verification."""
    h = jnp.maximum(x @ w1.T + b1, 0.0)
    return h @ w2.T + b2


if __name__ == "__main__":
    key = jax.random.PRNGKey(0)
    kx, kw1, kb1, kw2, kb2 = jax.random.split(key, 5)

    x = jax.random.normal(kx, (BATCH, SEQ, EMBED), dtype=jnp.float32)

    # Parameters in torch nn.Linear layout: weight (out, in), bias (out,).
    w1 = jax.random.normal(kw1, (HIDDEN, EMBED), dtype=jnp.float32) * 0.1
    b1 = jax.random.normal(kb1, (HIDDEN,), dtype=jnp.float32) * 0.1
    w2 = jax.random.normal(kw2, (EMBED, HIDDEN), dtype=jnp.float32) * 0.1
    b2 = jax.random.normal(kb2, (EMBED,), dtype=jnp.float32) * 0.1

    params = prepare_params(w1, b1, w2, b2)   # one-time init-side layout prep

    out = feed_forward(x, *params)
    out = jax.block_until_ready(out)

    ref = reference_ffn(x, w1, b1, w2, b2)
    assert out.shape == (BATCH, SEQ, EMBED)
    # bf16 MXU operands with f32 accumulation -> slightly wider tolerance.
    assert jnp.allclose(out, ref, atol=5e-2, rtol=5e-2), "mismatch vs. JAX reference"

    print("KERNEL_OK")
</pallas_src>

<mosaic_0001>
module attributes {stable_mosaic.version = 11 : i64} {
  func.func @ffn_kernel(%arg0: memref<16x32xf32, #tpu.memory_space<vmem>>, %arg1: memref<32x128xbf16, #tpu.memory_space<vmem>>, %arg2: memref<1x128xf32, #tpu.memory_space<vmem>>, %arg3: memref<128x32xbf16, #tpu.memory_space<vmem>>, %arg4: memref<1x32xf32, #tpu.memory_space<vmem>>, %arg5: memref<16x32xf32, #tpu.memory_space<vmem>>) attributes {dimension_semantics = [], scalar_prefetch = 0 : i64, scratch_operands = 0 : i64, tpu.core_type = #tpu.core_type<tc>} {
    %c0 = arith.constant 0 : index
    %c0_0 = arith.constant 0 : index
    %0 = vector.load %arg0[%c0, %c0_0] : memref<16x32xf32, #tpu.memory_space<vmem>>, vector<16x32xf32>
    %1 = arith.truncf %0 : vector<16x32xf32> to vector<16x32xbf16>
    %c0_1 = arith.constant 0 : index
    %c0_2 = arith.constant 0 : index
    %2 = vector.load %arg1[%c0_1, %c0_2] : memref<32x128xbf16, #tpu.memory_space<vmem>>, vector<32x128xbf16>
    %cst = arith.constant dense<0.000000e+00> : vector<16x128xf32>
    %3 = tpu.matmul %1, %2, %cst {dimension_numbers = #tpu.dot_dimension_numbers<[1], [0], [0], [1], [0, 0, 1, 1], [], []>} : vector<16x32xbf16>, vector<32x128xbf16>, vector<16x128xf32> -> vector<16x128xf32>
    %c0_3 = arith.constant 0 : index
    %c0_4 = arith.constant 0 : index
    %4 = vector.load %arg2[%c0_3, %c0_4] : memref<1x128xf32, #tpu.memory_space<vmem>>, vector<1x128xf32>
    %5 = vector.broadcast %4 : vector<1x128xf32> to vector<16x128xf32>
    %6 = arith.addf %3, %5 : vector<16x128xf32>
    %cst_5 = arith.constant 0.000000e+00 : f32
    %7 = vector.broadcast %cst_5 : f32 to vector<16x128xf32>
    %8 = arith.maximumf %6, %7 : vector<16x128xf32>
    %9 = arith.truncf %8 : vector<16x128xf32> to vector<16x128xbf16>
    %c0_6 = arith.constant 0 : index
    %c0_7 = arith.constant 0 : index
    %10 = vector.load %arg3[%c0_6, %c0_7] : memref<128x32xbf16, #tpu.memory_space<vmem>>, vector<128x32xbf16>
    %cst_8 = arith.constant dense<0.000000e+00> : vector<16x32xf32>
    %11 = tpu.matmul %9, %10, %cst_8 {dimension_numbers = #tpu.dot_dimension_numbers<[1], [0], [0], [1], [0, 0, 1, 1], [], []>} : vector<16x128xbf16>, vector<128x32xbf16>, vector<16x32xf32> -> vector<16x32xf32>
    %c0_9 = arith.constant 0 : index
    %c0_10 = arith.constant 0 : index
    %12 = vector.load %arg4[%c0_9, %c0_10] : memref<1x32xf32, #tpu.memory_space<vmem>>, vector<1x32xf32>
    %13 = vector.broadcast %12 : vector<1x32xf32> to vector<16x32xf32>
    %14 = arith.addf %11, %13 : vector<16x32xf32>
    %c0_11 = arith.constant 0 : index
    %c0_12 = arith.constant 0 : index
    %15 = vector.load %arg5[%c0_11, %c0_12] : memref<16x32xf32, #tpu.memory_space<vmem>>, vector<16x32xf32>
    tpu.vector_store %arg5[%c0_11, %c0_12], %14 {strides = array<i32>} : memref<16x32xf32, #tpu.memory_space<vmem>>, vector<16x32xf32>,
    return
  }
}

</mosaic_0001>

<bundles_post_ra>
// kernel: feed_forward.1
= control target key start
LH: loop header
LB: loop body
LE: loop exit
PB: predicated region body
PF: predicated region fallthrough
CT: control target
= control target key end

     0   :  { %s331_s0 = inlined_call_operand.vmem [shape: f32[16,32], index: 0, kind: input, shape index: {}]   ;;  %s332_s1 = inlined_call_operand.vmem [shape: bf16[32,128], index: 1, kind: input, shape index: {}]   ;;  %s333_s2 = inlined_call_operand.vmem [shape: f32[1,128], index: 2, kind: input, shape index: {}]   ;;  %s334_s3 = inlined_call_operand.vmem [shape: bf16[128,32], index: 3, kind: input, shape index: {}]   ;;  %s335_s4 = inlined_call_operand.vmem [shape: f32[1,32], index: 4, kind: input, shape index: {}]   ;;  %s336_s5 = inlined_call_operand.hbm [shape: f32[16,32], index: 5, kind: output, shape index: {}]  }
   0x1   :  { %v210_v0 = vld [vmem:[%s332_s1 + $0x8] sm:$0xff]  ;;  %v209_v1 = vld [vmem:[%s332_s1] sm:$0xff]  ;;  %v218_v2 = vld [vmem:[%s334_s3 + $0x38] sm:$0xff] }
   0x2   :  { %55 = vmatpush.bf16.msra.mxu0 %v210_v0  ;;  %v22_v3 = vld [vmem:[%s331_s0] sm:$0xff]  ;;  %v23_v4 = vld [vmem:[%s331_s0 + $0x8] sm:$0xff]  ;;  %134 = vmatpush.bf16.msra.mxu1 %v218_v2  ;;  %v217_v5 = vld [vmem:[%s334_s3 + $0x30] sm:$0xff] }
   0x3   :  { %10 = vsyncpa [#allocation3], 0  ;;  %v24_v6 = vpack.c.bf16 %v23_v4, %v22_v3  ;;  %vm45_vm0 = vcmask 261120   ;;  %v216_v7 = vld [vmem:[%s334_s3 + $0x28] sm:$0xff]  ;;  %v215_v8 = vld [vmem:[%s334_s3 + $0x20] sm:$0xff]  ;;  %s251_s22 = smov 128  }
   0x4   :  { %v214_v9 = vld [vmem:[%s334_s3 + $0x18] sm:$0xff]  ;;  %v213_v10 = vld [vmem:[%s334_s3 + $0x10] sm:$0xff]  ;;  %v212_v11 = vld [vmem:[%s334_s3 + $0x8] sm:$0xff]  ;;  %s252_s23 = smov 8  }
   0x5   :  { %v211_v12 = vld [vmem:[%s334_s3] sm:$0xff]  ;;  %s250_s3 = smov [#allocation2]  }
   0x6   :  { %56 = vmatpush.bf16.msra.mxu0 %v209_v1  ;;  %135 = vmatpush.bf16.msra.mxu1 %v217_v5  ;;  %v222_v14 = vld [vmem:[%s333_s2] ss:$0 sm:$0xff]  ;;  %s154_s19 = sshll.u32 %s250_s3, 4  ;;  %s156_s2 = sshll.u32 %s336_s5, 4  ;;  %s155_s19 = int_to_ptr.vmem [resolvable:$true] %s154_s19  ;;  %s157_s2 = int_to_ptr.hbm [resolvable:$true] %s156_s2 }
   0x7   :  { %v223_v21 = vld [vmem:[%s335_s4] ss:$0 sm:$0xff] }
   0x9   :  { %176 = vmatmul.msk.bf16.vlgmr.msra.gmra.mxu0 %vm45_vm0, %v24_v6 }
   0xa   :  { %136 = vmatpush.bf16.msra.mxu1 %v216_v7 }
   0xe   :  { %137 = vmatpush.bf16.msra.mxu1 %v215_v8 }
  0x12   :  { %138 = vmatpush.bf16.msra.mxu1 %v214_v9 }
  0x16   :  { %139 = vmatpush.bf16.msra.mxu1 %v213_v10 }
  0x1a   :  { %140 = vmatpush.bf16.msra.mxu1 %v212_v11 }
  0x1e   :  { %141 = vmatpush.bf16.msra.mxu1 %v211_v12 }
  0x86   :  { %v58_v13 = vpop.f32.mrf.mxu0 }
  0x87   :  { %v59_v15 = vadd.f32 %v222_v14, %v58_v13 }
  0x89   :  { %v63_v18 = vmax.f32 %v59_v15, 0.0 }
  0x8e   :  { %v60_v16 = vpop.f32.mrf.mxu0 }
  0x8f   :  { %v61_v17 = vadd.f32 %v222_v14, %v60_v16 }
  0x91   :  { %v64_v19 = vmax.f32 %v61_v17, 0.0 }
  0x93   :  { %v65_v20 = vpack.c.bf16 %v64_v19, %v63_v18 }
  0x95   :  { %142 = vmatmul.bf16.vlgmr.msra.gmra.mxu1 %v65_v20 }
 0x112   :  { %v143_v22 = vpop.f32.mrf.mxu1 }
 0x113   :  { %v144_v23 = vadd.f32 %v223_v21, %v143_v22 }
 0x115   :  { %148 = vst.msk [vmem:[#allocation2] sm:$0xff] %vm45_vm0, %v144_v23 }
 0x11a   :  { %v145_v24 = vpop.f32.mrf.mxu1 }
 0x11b   :  { %v146_v25 = vadd.f32 %v223_v21, %v145_v24 }
 0x11d   :  { %149 = vst.msk [vmem:[#allocation2 + $0x8] sm:$0xff] %vm45_vm0, %v146_v25 }
 0x11e   :  { %162 = dma.vmem_to_hbm [thread:$0]  %s155_s19, 256, %s157_s2, [#allocation3], %s251_s22, %s251_s22, %s252_s23  }
 0x11f   :  { %248 = dma.done.wait [#allocation3], 256  }
 0x120   :  { %249 = vsyncadd [#allocation3], 4294967040 }
 0x121   :  { %167 = vsyncpa [#allocation3], 1 }

</bundles_post_ra>
